<compile_context>
chip_gen: v5e
topology: v5e:2x2
jax: 0.10.0
libtpu: 0.0.40
codegen_flags: <defaults>
</compile_context>

<pallas_src>
import functools

import jax
import jax.numpy as jnp
from jax.experimental import pallas as pl
from jax.experimental.pallas import tpu as pltpu  # noqa: F401  (TPU backend)

ROWS = 2      # kron(ones(2,1), .) duplicates the weight row twice
FEATS = 52    # linear_weight is (1, 52)


def _generator0_kernel(w_ref, x_ref, x_out_ref, wm_ref, *, delta):
    # weight_mapped = tanh(w) * delta + 1        (EUP tanh + VPU mul/add, 1 row)
    wm = jnp.tanh(w_ref[...]) * delta + 1.0      # (1, FEATS)
    wm_ref[...] = wm.astype(wm_ref.dtype)
    # x_out = weight_mapped (row-broadcast) * x  (implicit sublane broadcast)
    x_out_ref[...] = (x_ref[...] * wm).astype(x_out_ref.dtype)


def generator0_forward(linear_weight, x, delta=0.2):
    """linear_weight: (1, 52), x: (2, 52) -> (x_out (2, 52), weight_mapped (1, 52))."""
    # delta is a fixed hyperparameter; baking it in as a Python constant is
    # intentional (changing it triggers a recompile).
    kernel = functools.partial(_generator0_kernel, delta=float(delta))

    # Truthful tiny cost: mul+add per weight lane, one mul per x element,
    # one tanh per weight lane; bytes = inputs + outputs.
    cost = pl.CostEstimate(
        flops=2 * FEATS + ROWS * FEATS,
        transcendentals=FEATS,
        bytes_accessed=2 * (FEATS + ROWS * FEATS) * 4,
    )

    x_out, weight_mapped = pl.pallas_call(
        kernel,
        out_shape=(
            jax.ShapeDtypeStruct((ROWS, FEATS), x.dtype),
            jax.ShapeDtypeStruct((1, FEATS), linear_weight.dtype),
        ),
        in_specs=[
            pl.BlockSpec((1, FEATS), lambda: (0, 0)),
            pl.BlockSpec((ROWS, FEATS), lambda: (0, 0)),
        ],
        out_specs=(
            pl.BlockSpec((ROWS, FEATS), lambda: (0, 0)),
            pl.BlockSpec((1, FEATS), lambda: (0, 0)),
        ),
        cost_estimate=cost,
    )(linear_weight, x)

    return x_out, weight_mapped


if __name__ == "__main__":
    key = jax.random.PRNGKey(0)
    k_w, k_x = jax.random.split(key)

    # Deterministic "parameter" init matching torch.rand(1, 52) (uniform [0,1)).
    linear_weight = jax.random.uniform(k_w, (1, FEATS), dtype=jnp.float32)
    # Example input consistent with the forward: x must broadcast with (2, 52).
    x = jax.random.normal(k_x, (ROWS, FEATS), dtype=jnp.float32)

    x_out, weight_mapped = generator0_forward(linear_weight, x, delta=0.2)
    jax.block_until_ready((x_out, weight_mapped))

    # Reference check in plain JAX (same math as the PyTorch module).
    wm_ref = jnp.tanh(linear_weight) * 0.2 + 1.0
    x_ref = jnp.kron(jnp.ones((ROWS, 1), jnp.float32), wm_ref) * x
    assert jnp.allclose(weight_mapped, wm_ref, atol=1e-6)
    assert jnp.allclose(x_out, x_ref, atol=1e-6)

    print("KERNEL_OK")
</pallas_src>

<mosaic_0001>
module attributes {stable_mosaic.version = 11 : i64} {
  func.func @_generator0_kernel(%arg0: memref<1x52xf32, #tpu.memory_space<vmem>>, %arg1: memref<2x52xf32, #tpu.memory_space<vmem>>, %arg2: memref<2x52xf32, #tpu.memory_space<vmem>>, %arg3: memref<1x52xf32, #tpu.memory_space<vmem>>) attributes {dimension_semantics = [], scalar_prefetch = 0 : i64, scratch_operands = 0 : i64, tpu.core_type = #tpu.core_type<tc>} {
    %c0 = arith.constant 0 : index
    %c0_0 = arith.constant 0 : index
    %0 = vector.load %arg0[%c0, %c0_0] : memref<1x52xf32, #tpu.memory_space<vmem>>, vector<1x52xf32>
    %1 = math.tanh %0 : vector<1x52xf32>
    %cst = arith.constant 2.000000e-01 : f32
    %2 = vector.broadcast %cst : f32 to vector<1x52xf32>
    %3 = arith.mulf %1, %2 : vector<1x52xf32>
    %cst_1 = arith.constant 1.000000e+00 : f32
    %4 = vector.broadcast %cst_1 : f32 to vector<1x52xf32>
    %5 = arith.addf %3, %4 : vector<1x52xf32>
    %c0_2 = arith.constant 0 : index
    %c0_3 = arith.constant 0 : index
    %6 = vector.load %arg3[%c0_2, %c0_3] : memref<1x52xf32, #tpu.memory_space<vmem>>, vector<1x52xf32>
    tpu.vector_store %arg3[%c0_2, %c0_3], %5 {strides = array<i32>} : memref<1x52xf32, #tpu.memory_space<vmem>>, vector<1x52xf32>,
    %c0_4 = arith.constant 0 : index
    %c0_5 = arith.constant 0 : index
    %7 = vector.load %arg1[%c0_4, %c0_5] : memref<2x52xf32, #tpu.memory_space<vmem>>, vector<2x52xf32>
    %8 = vector.broadcast %5 : vector<1x52xf32> to vector<2x52xf32>
    %9 = arith.mulf %7, %8 : vector<2x52xf32>
    %c0_6 = arith.constant 0 : index
    %c0_7 = arith.constant 0 : index
    %10 = vector.load %arg2[%c0_6, %c0_7] : memref<2x52xf32, #tpu.memory_space<vmem>>, vector<2x52xf32>
    tpu.vector_store %arg2[%c0_6, %c0_7], %9 {strides = array<i32>} : memref<2x52xf32, #tpu.memory_space<vmem>>, vector<2x52xf32>,
    return
  }
}

</mosaic_0001>

<bundles_post_ra>
// kernel: tpu_custom_call.1
= control target key start
LH: loop header
LB: loop body
LE: loop exit
PB: predicated region body
PF: predicated region fallthrough
CT: control target
= control target key end

     0   :  { %9 = vsyncpa [#allocation3], 0  ;;  %s236_s0 = inlined_call_operand.hbm [shape: f32[1,52], index: 0, kind: input, shape index: {}]   ;;  %s237_s1 = inlined_call_operand.hbm [shape: f32[2,52], index: 1, kind: input, shape index: {}]   ;;  %s238_s2 = inlined_call_operand.hbm [shape: f32[2,52], index: 2, kind: output, shape index: {0}]   ;;  %s239_s3 = inlined_call_operand.hbm [shape: f32[1,52], index: 3, kind: output, shape index: {1}]  }
   0x1   :  { %10 = vsyncpa [#allocation6], 0 }
   0x2   :  { %11 = vsyncpa [#allocation4], 0 }
   0x3   :  { %12 = vsyncpa [#allocation9], 0  ;;  %s18_s14 = sshll.u32 %s236_s0, 4  ;;  %s200_s15 = smov [#allocation2]   ;;  %s19_s14 = int_to_ptr.hbm [resolvable:$true] %s18_s14 }
   0x4   :  { %s20_s16 = sshll.u32 %s200_s15, 4  ;;  %s29_s19 = sshll.u32 %s237_s1, 4  ;;  %s21_s16 = int_to_ptr.vmem [resolvable:$true] %s20_s16  ;;  %s30_s19 = int_to_ptr.hbm [resolvable:$true] %s29_s19 }
   0x5   :  { %23 = dma.hbm_to_vmem [thread:$0]  %s19_s14, 16, %s21_s16, [#allocation3]  }
   0x6   :  { %s201_s20 = smov [#allocation5]  }
   0x7   :  { %s31_s21 = sshll.u32 %s201_s20, 4  ;;  %s32_s21 = int_to_ptr.vmem [resolvable:$true] %s31_s21 }
   0x8   :  { %34 = dma.hbm_to_vmem [thread:$0]  %s30_s19, 32, %s32_s21, [#allocation6]  }
   0x9   :  { %192 = dma.done.wait [#allocation3], 16  }
   0xa   :  { %193 = vsyncadd [#allocation3], 4294967280 }
   0xb   :  { %194 = dma.done.wait [#allocation6], 32  }
   0xc   :  { %195 = vsyncadd [#allocation6], 4294967264  ;;  %v43_v0 = vld [vmem:[#allocation2] sm:$0x1]  ;;  %s202_s0 = smov [#allocation8]   ;;  %s74_s25 = sshll.u32 %s239_s3, 4  ;;  %s75_s25 = int_to_ptr.hbm [resolvable:$true] %s74_s25 }
   0xd   :  { %94 = vtanh.f32 %v43_v0  ;;  %s72_s22 = sshll.u32 %s202_s0, 4  ;;  %vm47_vm0 = vcmask 417792   ;;  %v49_v4 = vld [vmem:[#allocation5] sm:$0x3]  ;;  %s203_s1 = smov [#allocation7]   ;;  %vm54_vm1 = vcmask 418816   ;;  %s73_s22 = int_to_ptr.vmem [resolvable:$true] %s72_s22 }
   0xe   :  { %s61_s26 = sshll.u32 %s203_s1, 4  ;;  %s63_s29 = sshll.u32 %s238_s2, 4  ;;  %s62_s26 = int_to_ptr.vmem [resolvable:$true] %s61_s26  ;;  %s64_s29 = int_to_ptr.hbm [resolvable:$true] %s63_s29 }
  0x13   :  { %v95_v1 = vpop.eup %94 }
  0x14   :  { %v45_v2 = vmul.f32 0.2, %v95_v1 }
  0x16   :  { %v46_v3 = vadd.f32 1.0, %v45_v2 }
  0x18   :  { %48 = vst.msk [vmem:[#allocation8] sm:$0x1] %vm47_vm0, %v46_v3  ;;  %v51_v5 = vperm.slane %v46_v3, 0 }
  0x19   :  { %77 = dma.vmem_to_hbm [thread:$0]  %s73_s22, 16, %s75_s25, [#allocation9]  }
  0x1a   :  { %v53_v6 = vmul.f32 %v51_v5, %v49_v4 }
  0x1c   :  { %55 = vst.msk [vmem:[#allocation7] sm:$0x3] %vm54_vm1, %v53_v6 }
  0x1d   :  { %66 = dma.vmem_to_hbm [thread:$0]  %s62_s26, 32, %s64_s29, [#allocation4]  }
  0x1e   :  { %196 = dma.done.wait [#allocation4], 32  }
  0x1f   :  { %197 = vsyncadd [#allocation4], 4294967264 }
  0x20   :  { %198 = dma.done.wait [#allocation9], 16  }
  0x21   :  { %199 = vsyncadd [#allocation9], 4294967280 }
  0x22   :  { %86 = vsyncpa [#allocation3], 1 }
  0x23   :  { %87 = vsyncpa [#allocation6], 1 }
  0x24   :  { %88 = vsyncpa [#allocation4], 1 }
  0x25   :  { %89 = vsyncpa [#allocation9], 1 }

</bundles_post_ra>
